<compile_context>
chip_gen: v6e
topology: v6e:2x2x1
jax: 0.10.0
libtpu: 0.0.40
codegen_flags: <defaults>
</compile_context>

<pallas_src>
import functools

import jax
import jax.numpy as jnp
from jax.experimental import pallas as pl
from jax.experimental.pallas import tpu as pltpu


def _conv1x1_bn_kernel(w_ref, x_ref, b_ref, scale_ref, shift_ref, o_ref):
    """One lane tile: o = (W @ x + b) * scale + shift.

    w_ref:     (Cout, Cin)   1x1 conv weight
    x_ref:     (Cin, TM)     channels on sublanes, batch*spatial on lanes
    b_ref:     (Cout, 1)     conv bias
    scale_ref: (Cout, 1)     BN scale  (gamma * rsqrt(var + eps)), or 1
    shift_ref: (Cout, 1)     BN shift  (beta - mean * scale), or 0
    o_ref:     (Cout, TM)    lane-dense output tile
    """
    z = jnp.dot(w_ref[...], x_ref[...], preferred_element_type=jnp.float32)
    z = (z + b_ref[...]) * scale_ref[...] + shift_ref[...]
    o_ref[...] = z.astype(o_ref.dtype)


def _round_up(a, b):
    return (a + b - 1) // b * b


def single_conv_block(x_nchw, w, b, gamma, beta, running_mean, running_var,
                      *, stride=1, use_bn=True, eps=1e-5):
    """Forward pass of SingleConvBlock.

    x_nchw: (N, Cin, H, W) float32
    w:      (Cout, Cin)    == PyTorch conv weight (Cout, Cin, 1, 1) squeezed
    b:      (Cout,)        conv bias
    gamma, beta, running_mean, running_var: (Cout,) BatchNorm parameters
    Returns (N, Cout, Ho, Wo) with Ho = floor((H-1)/stride)+1, same for Wo.
    """
    N, Cin, H, W = x_nchw.shape
    Cout = w.shape[0]

    # 1x1 conv with stride == channel matmul on the stride-subsampled grid.
    xs = x_nchw[:, :, ::stride, ::stride]                  # (N, Cin, Ho, Wo)
    Ho, Wo = xs.shape[2], xs.shape[3]
    M = N * Ho * Wo

    # Layout plumbing: channels -> sublanes, (n, ho, wo) -> lanes.
    x2d = jnp.transpose(xs, (1, 0, 2, 3)).reshape(Cin, M)  # (Cin, M)

    tm = min(512, _round_up(M, 128))
    M_pad = _round_up(M, tm)
    if M_pad != M:
        x2d = jnp.pad(x2d, ((0, 0), (0, M_pad - M)))

    # Fold eval-mode BatchNorm into a per-channel affine applied post-conv.
    if use_bn:
        scale = gamma * jax.lax.rsqrt(running_var + eps)
        shift = beta - running_mean * scale
    else:
        scale = jnp.ones((Cout,), jnp.float32)
        shift = jnp.zeros((Cout,), jnp.float32)

    w2 = w.astype(jnp.float32)
    b2 = b.reshape(Cout, 1).astype(jnp.float32)
    scale2 = scale.reshape(Cout, 1).astype(jnp.float32)
    shift2 = shift.reshape(Cout, 1).astype(jnp.float32)

    flops = 2 * M_pad * Cin * Cout + 3 * M_pad * Cout
    bytes_accessed = 4 * (Cin * M_pad + Cout * Cin + 3 * Cout + Cout * M_pad)

    out2d = pl.pallas_call(
        _conv1x1_bn_kernel,
        out_shape=jax.ShapeDtypeStruct((Cout, M_pad), jnp.float32),
        grid=(M_pad // tm,),
        in_specs=[
            pl.BlockSpec((Cout, Cin), lambda j: (0, 0)),   # weight, resident
            pl.BlockSpec((Cin, tm), lambda j: (0, j)),     # input lane tile
            pl.BlockSpec((Cout, 1), lambda j: (0, 0)),     # bias
            pl.BlockSpec((Cout, 1), lambda j: (0, 0)),     # bn scale
            pl.BlockSpec((Cout, 1), lambda j: (0, 0)),     # bn shift
        ],
        out_specs=pl.BlockSpec((Cout, tm), lambda j: (0, j)),
        compiler_params=pltpu.CompilerParams(
            dimension_semantics=("parallel",)),
        cost_estimate=pl.CostEstimate(
            flops=flops, transcendentals=0, bytes_accessed=bytes_accessed),
    )(w2, x2d, b2, scale2, shift2)

    out = out2d[:, :M].reshape(Cout, N, Ho, Wo)
    return jnp.transpose(out, (1, 0, 2, 3))                # (N, Cout, Ho, Wo)


def _reference(x, w, b, gamma, beta, running_mean, running_var,
               *, stride, use_bn, eps):
    """Pure-JAX reference (lax.conv + eval-mode BatchNorm)."""
    Cout, Cin = w.shape
    y = jax.lax.conv_general_dilated(
        x, w.reshape(Cout, Cin, 1, 1),
        window_strides=(stride, stride), padding="VALID",
        dimension_numbers=("NCHW", "OIHW", "NCHW"))
    y = y + b.reshape(1, -1, 1, 1)
    if use_bn:
        y = (y - running_mean.reshape(1, -1, 1, 1)) / jnp.sqrt(
            running_var.reshape(1, -1, 1, 1) + eps)
        y = y * gamma.reshape(1, -1, 1, 1) + beta.reshape(1, -1, 1, 1)
    return y


if __name__ == "__main__":
    # SingleConvBlock(in_features=4, out_features=8, stride=2, use_bs=True)
    N, Cin, H, W = 2, 4, 16, 16
    Cout, stride, eps = 8, 2, 1e-5

    key = jax.random.PRNGKey(0)
    kx, kw, kb, kg, kbt, km, kv = jax.random.split(key, 7)

    x = jax.random.normal(kx, (N, Cin, H, W), dtype=jnp.float32)
    w = jax.random.normal(kw, (Cout, Cin), dtype=jnp.float32) * (
        1.0 / jnp.sqrt(float(Cin)))
    b = jax.random.normal(kb, (Cout,), dtype=jnp.float32) * 0.1
    gamma = 1.0 + 0.1 * jax.random.normal(kg, (Cout,), dtype=jnp.float32)
    beta = 0.1 * jax.random.normal(kbt, (Cout,), dtype=jnp.float32)
    running_mean = 0.1 * jax.random.normal(km, (Cout,), dtype=jnp.float32)
    running_var = jnp.abs(jax.random.normal(kv, (Cout,), dtype=jnp.float32)) + 0.5

    for use_bn in (True, False):
        fwd = jax.jit(functools.partial(
            single_conv_block, stride=stride, use_bn=use_bn, eps=eps))
        out = fwd(x, w, b, gamma, beta, running_mean, running_var)
        out = jax.block_until_ready(out)

        ref = _reference(x, w, b, gamma, beta, running_mean, running_var,
                         stride=stride, use_bn=use_bn, eps=eps)
        assert out.shape == ref.shape == (N, Cout, 8, 8), (out.shape, ref.shape)
        assert jnp.allclose(out, ref, atol=1e-4, rtol=1e-4), float(
            jnp.max(jnp.abs(out - ref)))

    print("KERNEL_OK")
</pallas_src>

<mosaic_0001>
module attributes {stable_mosaic.version = 11 : i64} {
  func.func @_conv1x1_bn_kernel(%arg0: i32, %arg1: memref<8x4xf32, #tpu.memory_space<vmem>>, %arg2: memref<4x128xf32, #tpu.memory_space<vmem>>, %arg3: memref<8x1xf32, #tpu.memory_space<vmem>>, %arg4: memref<8x1xf32, #tpu.memory_space<vmem>>, %arg5: memref<8x1xf32, #tpu.memory_space<vmem>>, %arg6: memref<8x128xf32, #tpu.memory_space<vmem>>) attributes {dimension_semantics = [#tpu.dimension_semantics<parallel>], iteration_bounds = array<i64: 1>, scalar_prefetch = 0 : i64, scratch_operands = 0 : i64, tpu.core_type = #tpu.core_type<tc>, window_params = [{pipeline_mode = #tpu.pipeline_mode<synchronous>, transform_indices = @transform_0, window_bounds = array<i64: 8, 4>}, {transform_indices = @transform_1, window_bounds = array<i64: 4, 128>}, {pipeline_mode = #tpu.pipeline_mode<synchronous>, transform_indices = @transform_2, window_bounds = array<i64: 8, 1>}, {pipeline_mode = #tpu.pipeline_mode<synchronous>, transform_indices = @transform_3, window_bounds = array<i64: 8, 1>}, {pipeline_mode = #tpu.pipeline_mode<synchronous>, transform_indices = @transform_4, window_bounds = array<i64: 8, 1>}, {transform_indices = @transform_5, window_bounds = array<i64: 8, 128>}]} {
    %c0 = arith.constant 0 : index
    %c0_0 = arith.constant 0 : index
    %0 = vector.load %arg1[%c0, %c0_0] : memref<8x4xf32, #tpu.memory_space<vmem>>, vector<8x4xf32>
    %c0_1 = arith.constant 0 : index
    %c0_2 = arith.constant 0 : index
    %1 = vector.load %arg2[%c0_1, %c0_2] : memref<4x128xf32, #tpu.memory_space<vmem>>, vector<4x128xf32>
    %cst = arith.constant dense<0.000000e+00> : vector<8x128xf32>
    %2 = tpu.matmul %0, %1, %cst {dimension_numbers = #tpu.dot_dimension_numbers<[1], [0], [0], [1], [0, 0, 1, 1], [], []>} : vector<8x4xf32>, vector<4x128xf32>, vector<8x128xf32> -> vector<8x128xf32>
    %c0_3 = arith.constant 0 : index
    %c0_4 = arith.constant 0 : index
    %3 = vector.load %arg3[%c0_3, %c0_4] : memref<8x1xf32, #tpu.memory_space<vmem>>, vector<8x1xf32>
    %4 = vector.broadcast %3 : vector<8x1xf32> to vector<8x128xf32>
    %5 = arith.addf %2, %4 : vector<8x128xf32>
    %c0_5 = arith.constant 0 : index
    %c0_6 = arith.constant 0 : index
    %6 = vector.load %arg4[%c0_5, %c0_6] : memref<8x1xf32, #tpu.memory_space<vmem>>, vector<8x1xf32>
    %7 = vector.broadcast %6 : vector<8x1xf32> to vector<8x128xf32>
    %8 = arith.mulf %5, %7 : vector<8x128xf32>
    %c0_7 = arith.constant 0 : index
    %c0_8 = arith.constant 0 : index
    %9 = vector.load %arg5[%c0_7, %c0_8] : memref<8x1xf32, #tpu.memory_space<vmem>>, vector<8x1xf32>
    %10 = vector.broadcast %9 : vector<8x1xf32> to vector<8x128xf32>
    %11 = arith.addf %8, %10 : vector<8x128xf32>
    %c0_9 = arith.constant 0 : index
    %c0_10 = arith.constant 0 : index
    %12 = vector.load %arg6[%c0_9, %c0_10] : memref<8x128xf32, #tpu.memory_space<vmem>>, vector<8x128xf32>
    tpu.vector_store %arg6[%c0_9, %c0_10], %11 {strides = array<i32>} : memref<8x128xf32, #tpu.memory_space<vmem>>, vector<8x128xf32>,
    return
  }
  func.func @transform_0(%arg0: i32) -> (i32, i32) {
    %c0_i32 = arith.constant 0 : i32
    %c0_i32_0 = arith.constant 0 : i32
    %c0_i32_1 = arith.constant 0 : i32
    return %c0_i32, %c0_i32_0 : i32, i32
  }
  func.func @transform_1(%arg0: i32) -> (i32, i32) {
    %c0_i32 = arith.constant 0 : i32
    %c0_i32_0 = arith.constant 0 : i32
    return %c0_i32, %arg0 : i32, i32
  }
  func.func @transform_2(%arg0: i32) -> (i32, i32) {
    %c0_i32 = arith.constant 0 : i32
    %c0_i32_0 = arith.constant 0 : i32
    %c0_i32_1 = arith.constant 0 : i32
    return %c0_i32, %c0_i32_0 : i32, i32
  }
  func.func @transform_3(%arg0: i32) -> (i32, i32) {
    %c0_i32 = arith.constant 0 : i32
    %c0_i32_0 = arith.constant 0 : i32
    %c0_i32_1 = arith.constant 0 : i32
    return %c0_i32, %c0_i32_0 : i32, i32
  }
  func.func @transform_4(%arg0: i32) -> (i32, i32) {
    %c0_i32 = arith.constant 0 : i32
    %c0_i32_0 = arith.constant 0 : i32
    %c0_i32_1 = arith.constant 0 : i32
    return %c0_i32, %c0_i32_0 : i32, i32
  }
  func.func @transform_5(%arg0: i32) -> (i32, i32) {
    %c0_i32 = arith.constant 0 : i32
    %c0_i32_0 = arith.constant 0 : i32
    return %c0_i32, %arg0 : i32, i32
  }
}

</mosaic_0001>

<bundles_post_ra>
// kernel: single_conv_block.1
= control target key start
LH: loop header
LB: loop body
LE: loop exit
PB: predicated region body
PF: predicated region fallthrough
CT: control target
= control target key end

     0   :  { %vm32_vm0 = vcmask 1043456   ;;  %vm28_vm1 = vcmask 31744   ;;  %v139_v0 = vmov 0.0   ;;  %vm140_vm2 = vmmov 0   ;;  %s190_s1 = inlined_call_operand.vmem [shape: f32[4,128], index: 1, kind: input, shape index: {}]   ;;  %s191_s0 = inlined_call_operand.vmem [shape: f32[8,4], index: 0, kind: input, shape index: {}]   ;;  %s192_s2 = inlined_call_operand.vmem [shape: f32[8,1], index: 2, kind: input, shape index: {}]   ;;  %s193_s4 = inlined_call_operand.vmem [shape: f32[8,1], index: 4, kind: input, shape index: {}]   ;;  %s194_s3 = inlined_call_operand.vmem [shape: f32[8,1], index: 3, kind: input, shape index: {}]   ;;  %s195_s5 = inlined_call_operand.vmem [shape: f32[8,128], index: 5, kind: output, shape index: {}]  }
   0x1   :  { %129 = vmatprep.subr.mxu0 %v139_v0  ;;  %v21_v1 = vld [vmem:[%s190_s1] sm:$0xf]  ;;  %131 = vmatprep.mubr.msk.f32.mxu0 %vm140_vm2, %v139_v0  ;;  %v141_v4 = vmov 0  }
   0x2   :  { %v20_v2 = vld [vmem:[%s191_s0] sm:$0xff]  ;;  %130 = vmatpush3.msk.msra.mxu0 %vm32_vm0, %v21_v1  ;;  %137 = vset.pattern.permute.xlu0 %v141_v4 }
   0x3   :  { %v22_v3 = vld [vmem:[%s192_s2] sm:$0xff]  ;;  %132 = vmatmul.mubr.msk.f32.vlgmr.msra.gmra.mxu0 %vm28_vm1, %v20_v2  ;;  %138 = vset.pattern.permute.xlu1 %v141_v4 }
   0x4   :  { %v113_v5 = vld [vmem:[%s193_s4] sm:$0xff]  ;;  %25 = vperm.xlu0 %137, %v22_v3  }
   0x5   :  { %v106_v6 = vld [vmem:[%s194_s3] sm:$0xff]  ;;  %116 = vperm.xlu1 %138, %v113_v5  }
   0x8   :  { %109 = vperm.xlu0 %137, %v106_v6  }
  0x7f   :  { %v26_v7 = vpop.permute.xlu0 %25 }
  0x80   :  { %v117_v10 = vpop.permute.xlu1 %116 }
  0x83   :  { %v110_v11 = vpop.permute.xlu0 %109 }
  0xc3   :  { %v102_v8 = vpop.f32.mrf.mxu0 }
  0xc4   :  { %v103_v9 = vadd.f32 %v102_v8, %v26_v7 }
  0xc5   :  { %v133_v12 = vpop.f32.mrf.mxu0 }
  0xc6   :  { %v112_v13 = vmul.f32 %v110_v11, %v103_v9 }
  0xc8   :  { %v119_v14 = vadd.f32 %v117_v10, %v112_v13 }
  0xca   :  { %120 = vst [vmem:[%s195_s5] sm:$0xff] %v119_v14 }

</bundles_post_ra>
